<compile_context>
chip_gen: v7x
topology: tpu7x:2x2x1
jax: 0.10.0
libtpu: 0.0.40
codegen_flags: <defaults>
</compile_context>

<pallas_src>
import math

import jax
import jax.numpy as jnp
from jax.experimental import pallas as pl
from jax.experimental.pallas import tpu as pltpu

# ---- ELEMENTS config (deterministic, typical hybrik values) -----------------
BETA_WEIGHT = 1.0
THETA_WEIGHT = 0.01
TWIST_WEIGHT = 0.01
UVD24_WEIGHT = 1.0
SIZE_AVERAGE = True   # matches nn.Module default size_average=True

_LANE = 128
_MSE_LANES = 384      # [beta+twist: 0:128 | theta: 128:384]
_TOTAL_LANES = 512    # + [uvd: 384:512]


def _l1_loss_dim_smpl_kernel(slab_ref, out_ref):
    """slab_ref: (3, B, 512) f32 VMEM (rows: pred / target / weight).

    The weight lanes of the three MSE segments carry sqrt(loss_w / count) and
    the smpl / theta / twist weights (folded host-side), so the MSE part is a
    single sum((d*w)^2) over lanes [0:384]. Lanes [384:512] hold the uvd L1
    term; its weights are the raw visibility mask (needed for the
    size_average divisor).
    """
    p = slab_ref[0]                  # (B, 512)
    t = slab_ref[1]
    w = slab_ref[2]
    d = p - t

    # --- beta + theta + twist MSE terms, collapsed to one reduction ---------
    dm = d[:, :_MSE_LANES] * w[:, :_MSE_LANES]
    mse_part = jnp.sum(dm * dm)      # loss weights & 1/count already folded in

    # --- uvd weighted L1:  |64*a - 64*b| == 64*|a - b| exactly --------------
    uw = w[:, _MSE_LANES:]
    l1_sum = jnp.sum(jnp.abs(d[:, _MSE_LANES:]) * uw) * 64.0
    w_sum = jnp.sum(uw)
    if SIZE_AVERAGE:
        safe_den = jnp.where(w_sum > 0.0, w_sum, 1.0)   # guard dead-branch NaN
        loss_uvd = jnp.where(w_sum > 0.0, l1_sum / safe_den, l1_sum)
    else:
        loss_uvd = l1_sum

    out_ref[0, 0] = mse_part + loss_uvd * UVD24_WEIGHT


def _flat2(x):
    return jnp.asarray(x, jnp.float32).reshape(x.shape[0], -1)


def _pack_row(beta, twist, theta, uvd):
    """(B,10)+(B,46) -> 128 lanes | (B,216) -> 256 | (B,72) -> 128  => (B, 512)."""
    seg0 = jnp.concatenate([beta, twist], axis=1)                 # (B, 56)
    seg0 = jnp.pad(seg0, ((0, 0), (0, _LANE - seg0.shape[1])))
    seg1 = jnp.pad(theta, ((0, 0), (0, 2 * _LANE - theta.shape[1])))
    seg2 = jnp.pad(uvd, ((0, 0), (0, _LANE - uvd.shape[1])))
    return jnp.concatenate([seg0, seg1, seg2], axis=1)            # (B, 512)


@jax.jit
def l1_loss_dim_smpl(pred_shape, pred_theta_mats, pred_phi, pred_uvd_jts, labels):
    """JAX/Pallas equivalent of L1LossDimSMPL.forward. Returns a scalar f32."""
    B = pred_shape.shape[0]
    n_jts = pred_uvd_jts.shape[1]

    p_beta = _flat2(pred_shape)                                   # (B, 10)
    p_theta = _flat2(pred_theta_mats)                             # (B, 216)
    p_twist = _flat2(pred_phi)                                    # (B, 46)
    p_uvd = _flat2(pred_uvd_jts)                                  # (B, 72)

    t_beta = _flat2(labels['target_beta'])
    t_theta = _flat2(labels['target_theta'])
    t_twist = _flat2(labels['target_twist'])
    t_uvd = _flat2(labels['target_uvd_29'][:, :n_jts])

    sw = _flat2(labels['target_smpl_weight'])                     # (B, 1)
    theta_w = _flat2(labels['target_theta_weight'])
    twist_w = _flat2(labels['target_twist_weight'])
    uvd_w = _flat2(labels['target_weight_29'][:, :n_jts])

    # Fold sqrt(loss_weight / element_count) and the per-batch smpl weight
    # into the weight lanes so the three MSE terms become one reduction.
    # (Under the surrounding jit these fuse into the slab-building fusion;
    # nothing extra is materialized to HBM.)
    w_beta = jnp.broadcast_to(sw, p_beta.shape) * math.sqrt(
        BETA_WEIGHT / (B * p_beta.shape[1]))
    w_theta = (sw * theta_w) * math.sqrt(THETA_WEIGHT / (B * p_theta.shape[1]))
    w_twist = twist_w * math.sqrt(TWIST_WEIGHT / (B * p_twist.shape[1]))

    slab = jnp.stack([
        _pack_row(p_beta, p_twist, p_theta, p_uvd),
        _pack_row(t_beta, t_twist, t_theta, t_uvd),
        _pack_row(w_beta, w_twist, w_theta, uvd_w),
    ])                                                            # (3, B, 512)

    cost = pl.CostEstimate(
        flops=10 * 3 * B * _TOTAL_LANES,
        transcendentals=0,
        bytes_accessed=3 * B * _TOTAL_LANES * 4 + 4,
    )

    out = pl.pallas_call(
        _l1_loss_dim_smpl_kernel,
        out_shape=jax.ShapeDtypeStruct((1, 1), jnp.float32),
        in_specs=[pl.BlockSpec(memory_space=pltpu.MemorySpace.VMEM)],
        out_specs=pl.BlockSpec(memory_space=pltpu.MemorySpace.SMEM),
        cost_estimate=cost,
    )(slab)
    # TODO(synk): at B in the thousands, add a batch grid (tile ~(512, 512) f32,
    # fits v7x's 32 MiB default scoped VMEM) emitting per-block partial sums
    # summed in the wrapper, so a "parallel" batch axis is megacore-safe on v7x.
    return out[0, 0]


def _reference(pred_shape, pred_theta_mats, pred_phi, pred_uvd_jts, labels):
    sw = labels['target_smpl_weight']
    mse = lambda a, b: jnp.mean((a - b) ** 2)
    loss_beta = mse(pred_shape * sw, labels['target_beta'] * sw)
    loss_theta = mse(pred_theta_mats * sw * labels['target_theta_weight'],
                     labels['target_theta'] * sw * labels['target_theta_weight'])
    loss_twist = mse(pred_phi * labels['target_twist_weight'],
                     labels['target_twist'] * labels['target_twist_weight'])
    n_jts = pred_uvd_jts.shape[1]
    t_uvd = labels['target_uvd_29'][:, :n_jts]
    w_uvd = labels['target_weight_29'][:, :n_jts]
    out = jnp.abs(pred_uvd_jts * 64.0 - t_uvd * 64.0) * w_uvd
    wsum = jnp.sum(w_uvd)
    loss_uvd = jnp.where(wsum > 0, jnp.sum(out) / jnp.where(wsum > 0, wsum, 1.0),
                         jnp.sum(out))
    return (loss_beta * BETA_WEIGHT + loss_theta * THETA_WEIGHT
            + loss_twist * TWIST_WEIGHT + loss_uvd * UVD24_WEIGHT)


if __name__ == "__main__":
    key = jax.random.PRNGKey(0)
    ks = jax.random.split(key, 12)
    B = 2

    # "output" fields
    pred_shape = jax.random.normal(ks[0], (B, 10), jnp.float32)
    pred_theta_mats = jax.random.normal(ks[1], (B, 216), jnp.float32)   # 24 joints * 3x3
    pred_phi = jax.random.normal(ks[2], (B, 23, 2), jnp.float32)
    pred_uvd_jts = 0.5 * jax.random.normal(ks[3], (B, 24, 3), jnp.float32)

    # "labels" dict
    labels = {
        'target_smpl_weight': jnp.ones((B, 1), jnp.float32),
        'target_beta': jax.random.normal(ks[4], (B, 10), jnp.float32),
        'target_theta': jax.random.normal(ks[5], (B, 216), jnp.float32),
        'target_theta_weight': jax.random.uniform(ks[6], (B, 216), jnp.float32),
        'target_twist': jax.random.normal(ks[7], (B, 23, 2), jnp.float32),
        'target_twist_weight': (jax.random.uniform(ks[8], (B, 23, 2)) > 0.5).astype(jnp.float32),
        'target_uvd_29': 0.5 * jax.random.normal(ks[9], (B, 29, 3), jnp.float32),
        'target_weight_29': (jax.random.uniform(ks[10], (B, 29, 3)) > 0.3).astype(jnp.float32),
    }

    loss = l1_loss_dim_smpl(pred_shape, pred_theta_mats, pred_phi, pred_uvd_jts, labels)
    loss = jax.block_until_ready(loss)

    ref = _reference(pred_shape, pred_theta_mats, pred_phi, pred_uvd_jts, labels)
    assert jnp.allclose(loss, ref, rtol=1e-4, atol=1e-5), (loss, ref)
    print("KERNEL_OK")
</pallas_src>

<mosaic_0001>
module attributes {stable_mosaic.version = 11 : i64} {
  func.func @_l1_loss_dim_smpl_kernel(%arg0: memref<3x2x512xf32, #tpu.memory_space<vmem>>, %arg1: memref<1x1xf32, #tpu.memory_space<smem>>) attributes {dimension_semantics = [], scalar_prefetch = 0 : i64, scratch_operands = 0 : i64, tpu.core_type = #tpu.core_type<tc>} {
    %c0 = arith.constant 0 : index
    %c0_0 = arith.constant 0 : index
    %c0_1 = arith.constant 0 : index
    %0 = vector.load %arg0[%c0, %c0_0, %c0_1] : memref<3x2x512xf32, #tpu.memory_space<vmem>>, vector<1x2x512xf32>
    %1 = vector.shape_cast %0 : vector<1x2x512xf32> to vector<2x512xf32>
    %c1 = arith.constant 1 : index
    %c0_2 = arith.constant 0 : index
    %c0_3 = arith.constant 0 : index
    %2 = vector.load %arg0[%c1, %c0_2, %c0_3] : memref<3x2x512xf32, #tpu.memory_space<vmem>>, vector<1x2x512xf32>
    %3 = vector.shape_cast %2 : vector<1x2x512xf32> to vector<2x512xf32>
    %c2 = arith.constant 2 : index
    %c0_4 = arith.constant 0 : index
    %c0_5 = arith.constant 0 : index
    %4 = vector.load %arg0[%c2, %c0_4, %c0_5] : memref<3x2x512xf32, #tpu.memory_space<vmem>>, vector<1x2x512xf32>
    %5 = vector.shape_cast %4 : vector<1x2x512xf32> to vector<2x512xf32>
    %6 = arith.subf %1, %3 : vector<2x512xf32>
    %7 = vector.extract_strided_slice %6 {offsets = [0, 0], sizes = [2, 384], strides = [1, 1]} : vector<2x512xf32> to vector<2x384xf32>
    %8 = vector.extract_strided_slice %5 {offsets = [0, 0], sizes = [2, 384], strides = [1, 1]} : vector<2x512xf32> to vector<2x384xf32>
    %9 = arith.mulf %7, %8 : vector<2x384xf32>
    %10 = arith.mulf %9, %9 : vector<2x384xf32>
    %11 = vector.shape_cast %10 : vector<2x384xf32> to vector<1x2x384xf32>
    %cst = arith.constant dense<0.000000e+00> : vector<1xf32>
    %12 = vector.multi_reduction <add>, %11, %cst [1, 2] : vector<1x2x384xf32> to vector<1xf32>
    %13 = vector.shape_cast %12 : vector<1xf32> to vector<1x1x1xf32>
    %14 = vector.extract %13[0, 0, 0] : f32 from vector<1x1x1xf32>
    %15 = vector.extract_strided_slice %5 {offsets = [0, 384], sizes = [2, 128], strides = [1, 1]} : vector<2x512xf32> to vector<2x128xf32>
    %16 = vector.extract_strided_slice %6 {offsets = [0, 384], sizes = [2, 128], strides = [1, 1]} : vector<2x512xf32> to vector<2x128xf32>
    %17 = math.absf %16 : vector<2x128xf32>
    %18 = arith.mulf %17, %15 : vector<2x128xf32>
    %19 = vector.shape_cast %18 : vector<2x128xf32> to vector<1x2x128xf32>
    %cst_6 = arith.constant dense<0.000000e+00> : vector<1xf32>
    %20 = vector.multi_reduction <add>, %19, %cst_6 [1, 2] : vector<1x2x128xf32> to vector<1xf32>
    %21 = vector.shape_cast %20 : vector<1xf32> to vector<1x1x1xf32>
    %22 = vector.extract %21[0, 0, 0] : f32 from vector<1x1x1xf32>
    %cst_7 = arith.constant 6.400000e+01 : f32
    %23 = arith.mulf %22, %cst_7 : f32
    %24 = vector.shape_cast %15 : vector<2x128xf32> to vector<1x2x128xf32>
    %cst_8 = arith.constant dense<0.000000e+00> : vector<1xf32>
    %25 = vector.multi_reduction <add>, %24, %cst_8 [1, 2] : vector<1x2x128xf32> to vector<1xf32>
    %26 = vector.shape_cast %25 : vector<1xf32> to vector<1x1x1xf32>
    %27 = vector.extract %26[0, 0, 0] : f32 from vector<1x1x1xf32>
    %cst_9 = arith.constant 0.000000e+00 : f32
    %28 = arith.cmpf ogt, %27, %cst_9 : f32
    %cst_10 = arith.constant 1.000000e+00 : f32
    %29 = arith.select %28, %27, %cst_10 : f32
    %cst_11 = arith.constant 0.000000e+00 : f32
    %30 = arith.cmpf ogt, %27, %cst_11 : f32
    %31 = arith.divf %23, %29 : f32
    %32 = arith.select %30, %31, %23 : f32
    %cst_12 = arith.constant 1.000000e+00 : f32
    %33 = arith.mulf %32, %cst_12 : f32
    %34 = arith.addf %14, %33 : f32
    %c0_13 = arith.constant 0 : index
    %c0_14 = arith.constant 0 : index
    %35 = memref.load %arg1[%c0_13, %c0_14] : memref<1x1xf32, #tpu.memory_space<smem>>
    memref.store %34, %arg1[%c0_13, %c0_14] : memref<1x1xf32, #tpu.memory_space<smem>>
    return
  }
}

</mosaic_0001>

<bundles_post_ra>
// kernel: l1_loss_dim_smpl.1
= control target key start
LH: loop header
LB: loop body
LE: loop exit
PB: predicated region body
PF: predicated region fallthrough
CT: control target
= control target key end

     0   :  { %v22_v3 = vlaneseq  ;;  %v130_v6 = vmov 1983009808   ;;  %s168_s0 = inlined_call_operand.vmem [shape: f32[3,2,512], index: 0, kind: input, shape index: {}]   ;;  %s169_s1 = inlined_call_operand.hbm [shape: f32[1,1], index: 1, kind: output, shape index: {}]  }
   0x1   :  { %v105_v0 = vld [vmem:[%s168_s0 + $0x10] sm:$0xff]  ;;  %v9_v1 = vld [vmem:[%s168_s0] sm:$0xff]  ;;  %v104_v2 = vld [vmem:[%s168_s0 + $0x8] sm:$0xff]  ;;  %v20_v7 = vunpack.c.l.s4 %v130_v6 }
   0x2   :  { %v57_v4 = vrot.slane %v105_v0, 6  ;;  %v14_v5 = vsub.f32 %v9_v1, %v104_v2 }
   0x3   :  { %6 = vsyncpa [#allocation3], 0  ;;  %vm37_vm0 = vcmask 1041408   ;;  %v23_v8 = vshrl.u32 %v22_v3, 7  ;;  %v21_v11 = vunpack.c.0.s8 %v20_v7  ;;  %s118_s20 = scalar_lea.hbm %s169_s1, 16 }
   0x4   :  { %v71_v9 = vsel %vm37_vm0, %v57_v4, 0.0  ;;  %v15_v10 = vmul.f32 %v105_v0, %v14_v5  ;;  %v53_v14 = vrot.slane %v14_v5, 6  ;;  %p119_p1 = scmp.ne.s32.totalorder %s169_s1, %s118_s20  ;;  %p122_p2 = scmp.lt.u32.totalorder %s118_s20, %s169_s1 }
   0x5   :  { %72 = vadd.xlane.f32.xlu1 %v71_v9  ;;  %v24_v13 = vsub.s32 %v21_v11, %v23_v8 }
   0x6   :  { %v16_v12 = vmul.f32 %v15_v10, %v15_v10  ;;  %v55_v20 = vand.u32 2147483647, %v53_v14  ;;  %p124_p3 = pnand %p122_p2, %p119_p1 }
   0x8   :  { %v18_v15 = vcombine.high %v16_v12, %v16_v12  ;;  %v25_v16 = vrot.slane %v16_v12, %v24_v13  ;;  %v59_v24 = vmul.f32 %v57_v4, %v55_v20 }
   0xa   :  { %v32_v17 = vrot.slane %v18_v15, %v24_v13  ;;  %v33_v18 = vcombine.high %v25_v16, %v25_v16  ;;  %v38_v19 = vsel %vm37_vm0, %v25_v16, 0.0  ;;  %v60_v26 = vsel %vm37_vm0, %v59_v24, 0.0 }
   0xc   :  { %v39_v21 = vsel %vm37_vm0, %v33_v18, 0.0  ;;  %v41_v22 = vsel %vm37_vm0, %v32_v17, 0.0 }
   0xd   :  { %v40_v23 = vadd.f32 %v39_v21, %v38_v19 }
   0xf   :  { %v42_v25 = vadd.f32 %v41_v22, %v40_v23 }
  0x11   :  { %43 = vadd.xlane.f32.xlu0 %v42_v25 }
  0x15   :  { %61 = vadd.xlane.f32.xlu0 %v60_v26 }
  0x92   :  { %v73_v27 = vpop.xlane.xlu1 %72 }
  0x93   :  { %v74_v28 = vrot.slane %v73_v27, 4 }
  0x95   :  { %v75_v29 = vadd.f32 %v74_v28, %v73_v27 }
  0x97   :  { %v76_v33 = vrot.slane %v75_v29, 2 }
  0x99   :  { %v77_v39 = vadd.f32 %v76_v33, %v75_v29 }
  0x9b   :  { %v78_v44 = vrot.slane %v77_v39, 1 }
  0x9d   :  { %v79_v47 = vadd.f32 %v78_v44, %v77_v39 }
  0x9e   :  { %v44_v30 = vpop.xlane.xlu0 %43 }
  0x9f   :  { %v45_v31 = vrot.slane %v44_v30, 4 }
  0xa1   :  { %v46_v32 = vadd.f32 %v45_v31, %v44_v30 }
  0xa2   :  { %v62_v34 = vpop.xlane.xlu0 %61 }
  0xa3   :  { %v47_v35 = vrot.slane %v46_v32, 2  ;;  %v63_v36 = vrot.slane %v62_v34, 4 }
  0xa5   :  { %v64_v37 = vadd.f32 %v63_v36, %v62_v34  ;;  %v48_v38 = vadd.f32 %v47_v35, %v46_v32 }
  0xa7   :  { %v65_v40 = vrot.slane %v64_v37, 2  ;;  %v49_v41 = vrot.slane %v48_v38, 1 }
  0xa9   :  { %v66_v42 = vadd.f32 %v65_v40, %v64_v37  ;;  %v50_v43 = vadd.f32 %v49_v41, %v48_v38 }
  0xab   :  { %106 = vpush %v50_v43  ;;  %v67_v45 = vrot.slane %v66_v42, 1 }
  0xad   :  { %v68_v46 = vadd.f32 %v67_v45, %v66_v42 }
  0xaf   :  { %108 = vpush %v68_v46 }
  0xb0   :  { %110 = vpush %v79_v47 }
  0xdc   :  { %s107_s0 = spop %106 }
  0xe0   :  { %s109_s12 = spop %108 }
  0xe1   :  { %s111_s13 = spop %110  ;;  %s70_s14 = smul.f32 64.0, %s109_s12 }
  0xe2   :  { %p81_p0 = scmp.gt.f32.partialorder %s111_s13, 0.0 }
  0xe4   :  { %s171_s13 = smov (!%p81_p0, %s111_s13), 1.0 }
  0xe5   :  { %v83_v48 = vstv %s171_s13 }
  0xe6   :  { %116 = vrcp.f32 %v83_v48 }
  0xf0   :  { %v117_v49 = vpop.eup %116 }
  0xf1   :  { %112 = vpush %v117_v49 }
 0x122   :  { %s113_s15 = spop %112 }
 0x123   :  { %s86_s16 = smul.f32 %s113_s15, %s70_s14 }
 0x125   :  { %s173_s16 = smov (!%p81_p0, %s86_s16), %s70_s14 }
 0x126   :  { %s88_s17 = sadd.f32 %s107_s0, %s173_s16 }
 0x128   :  { %90 = sst [smem:[#allocation2]] %s88_s17 }
 0x129   :  { %127 = shalt.err (!%p124_p3)
}
 0x12a   :  { %s131_s25 = smov [#allocation2]  }
 0x12b   :  { %98 = dma.smem_to_hbm %s131_s25, 16, %s169_s1, [#allocation3]  }
 0x12c   :  { %128 = dma.done.wait [#allocation3], 16  }
 0x12d   :  { %129 = vsyncadd [#allocation3], 4294967280 }
 0x12e   :  { %102 = sfence }
 0x12f   :  { %103 = vsyncpa [#allocation3], 1 }

</bundles_post_ra>
